<compile_context>
chip_gen: v6e
topology: v6e:2x2x1
jax: 0.10.0
libtpu: 0.0.40
codegen_flags: <defaults>
</compile_context>

<pallas_src>
import math

import jax
import jax.numpy as jnp
from jax.experimental import pallas as pl
from jax.experimental.pallas import tpu as pltpu


def _round_up(x, m):
    return ((x + m - 1) // m) * m


def _pick_tile(n_rows, max_rows, *, target_steps=8, min_rows=1024):
    """Row-tile (multiple of 8 sublanes): big enough to amortise per-step
    overhead, small enough to keep >= ~target_steps grid steps and fit VMEM."""
    full = _round_up(max(n_rows, 1), 8)
    tb = _round_up(-(-n_rows // target_steps), 8)   # split into ~target_steps
    tb = max(tb, min_rows)                          # don't go tiny
    tb = min(tb, _round_up(max_rows, 8), full)      # VMEM cap / whole array
    return _round_up(max(tb, 8), 8)


def _temporal_decay_kernel(d_ref, w_ref, b_ref, o_ref):
    # d_ref: (TB, K) ; w_ref: (K, N) (already negated) ; b_ref: (1, N) (negated)
    # o_ref: (TB, N).   gamma = exp(-relu(d@W^T+b)) == exp(min(-(d@W^T+b), 0)).
    z = jnp.dot(d_ref[...], w_ref[...], preferred_element_type=jnp.float32)
    z = z + b_ref[...].astype(jnp.float32)
    o_ref[...] = jnp.exp(jnp.minimum(z, 0.0)).astype(o_ref.dtype)   # EUP exp


def temporal_decay(d, W, b, *, block_rows=8192):
    """Forward of TemporalDecay.

    d: (..., input_size)   W: (output_size, input_size)   b: (output_size,)
    returns gamma with shape (..., output_size), same dtype as d.
    """
    in_size = d.shape[-1]
    out_size, in_size_w = W.shape
    assert in_size == in_size_w

    lead_shape = d.shape[:-1]
    d2 = d.reshape(-1, in_size)
    B = d2.shape[0]

    # Fold the negation into the (tiny) parameters once, on the host.
    Wn = (-W).astype(jnp.float32)
    bn = (-b).astype(jnp.float32)

    # Lane-packed fast path: view (B, k) as (B*k//128, 128) (free, row-major
    # byte-identical) and contract with the 128x128 block-diagonal kron.
    pack = 128 // in_size if (in_size <= 128 and 128 % in_size == 0) else 0
    fast = (in_size == out_size) and (pack > 1) and (B > 0) and (B % pack == 0)

    if fast:
        x = d2.reshape(B // pack, 128)
        Wm = jnp.kron(jnp.eye(pack, dtype=jnp.float32), Wn.T)   # (128, 128)
        bm = jnp.tile(bn, pack).reshape(1, 128)
    else:
        x = d2
        Wm = Wn.T                                                # (in, out)
        bm = bn.reshape(1, out_size)

    n_rows, k_dim = x.shape
    n_cols = Wm.shape[1]

    TB = _pick_tile(n_rows, block_rows)
    grid = (pl.cdiv(n_rows, TB),)      # ragged last block handled by Pallas

    out = pl.pallas_call(
        _temporal_decay_kernel,
        out_shape=jax.ShapeDtypeStruct((n_rows, n_cols), d.dtype),
        grid_spec=pltpu.PrefetchScalarGridSpec(
            num_scalar_prefetch=0,
            grid=grid,
            in_specs=[
                pl.BlockSpec((TB, k_dim), lambda i: (i, 0)),        # d tile
                pl.BlockSpec((k_dim, n_cols), lambda i: (0, 0)),    # W (replicated)
                pl.BlockSpec((1, n_cols), lambda i: (0, 0)),        # b (replicated)
            ],
            out_specs=pl.BlockSpec((TB, n_cols), lambda i: (i, 0)),
        ),
        compiler_params=pltpu.CompilerParams(
            dimension_semantics=("parallel",),       # shards grid across TCs on v7x
            vmem_limit_bytes=32 * 1024 * 1024,       # safe on v5e/v6e/v7x
        ),
        cost_estimate=pl.CostEstimate(
            flops=2 * n_rows * k_dim * n_cols,
            transcendentals=n_rows * n_cols,
            bytes_accessed=4 * (n_rows * k_dim
                                + k_dim * n_cols
                                + n_cols
                                + n_rows * n_cols),
        ),
    )(x, Wm, bm)

    # Byte-identical reshape back to the natural (..., output_size) layout.
    return out.reshape(*lead_shape, out_size)


def reference(d, W, b):
    gamma = jnp.maximum(d @ W.T + b, 0.0)
    return jnp.exp(-gamma)


def _check(out, ref, name):
    out = jax.block_until_ready(out)
    assert out.shape == ref.shape, f"{name}: shape {out.shape} vs {ref.shape}"
    assert jnp.allclose(out, ref, atol=1e-5, rtol=1e-5), f"{name}: mismatch"


if __name__ == "__main__":
    key = jax.random.PRNGKey(0)
    k_d, k_w, k_b, k_d2, k_w2, k_b2 = jax.random.split(key, 6)

    # ---- Case 1: square (fast lane-packed path), ragged grid tile ----------
    batch, input_size, output_size = 200, 32, 32
    stdv = 1.0 / math.sqrt(output_size)
    W = jax.random.uniform(k_w, (output_size, input_size), jnp.float32,
                           minval=-stdv, maxval=stdv)
    b = jax.random.uniform(k_b, (output_size,), jnp.float32,
                           minval=-stdv, maxval=stdv)
    d = jax.random.uniform(k_d, (batch, input_size), jnp.float32,
                           minval=0.0, maxval=5.0)

    _check(temporal_decay(d, W, b), reference(d, W, b), "fast/2d")

    # Same data, tiny tile -> multi-step grid + masked ragged final block.
    _check(temporal_decay(d, W, b, block_rows=16), reference(d, W, b),
           "fast/multi-step")

    # Leading dims like F.linear: (4, 50, input_size).
    d3 = d.reshape(4, 50, input_size)
    _check(temporal_decay(d3, W, b), reference(d3, W, b), "fast/3d")

    # ---- Case 2: non-square (general fallback path) ------------------------
    in2, out2 = 48, 24
    stdv2 = 1.0 / math.sqrt(out2)
    W2 = jax.random.uniform(k_w2, (out2, in2), jnp.float32,
                            minval=-stdv2, maxval=stdv2)
    b2 = jax.random.uniform(k_b2, (out2,), jnp.float32,
                            minval=-stdv2, maxval=stdv2)
    dg = jax.random.uniform(k_d2, (200, in2), jnp.float32,
                            minval=0.0, maxval=5.0)
    _check(temporal_decay(dg, W2, b2), reference(dg, W2, b2), "general")

    print("KERNEL_OK")
</pallas_src>

<mosaic_0001>
module attributes {stable_mosaic.version = 11 : i64} {
  func.func @_temporal_decay_kernel(%arg0: i32, %arg1: memref<56x128xf32, #tpu.memory_space<vmem>>, %arg2: memref<128x128xf32, #tpu.memory_space<vmem>>, %arg3: memref<1x128xf32, #tpu.memory_space<vmem>>, %arg4: memref<56x128xf32, #tpu.memory_space<vmem>>) attributes {dimension_semantics = [#tpu.dimension_semantics<parallel>], iteration_bounds = array<i64: 1>, scalar_prefetch = 0 : i64, scratch_operands = 0 : i64, tpu.core_type = #tpu.core_type<tc>, window_params = [{transform_indices = @transform_0, window_bounds = array<i64: 56, 128>}, {pipeline_mode = #tpu.pipeline_mode<synchronous>, transform_indices = @transform_1, window_bounds = array<i64: 128, 128>}, {pipeline_mode = #tpu.pipeline_mode<synchronous>, transform_indices = @transform_2, window_bounds = array<i64: 1, 128>}, {transform_indices = @transform_3, window_bounds = array<i64: 56, 128>}]} {
    %c0 = arith.constant 0 : index
    %c0_0 = arith.constant 0 : index
    %0 = vector.load %arg1[%c0, %c0_0] : memref<56x128xf32, #tpu.memory_space<vmem>>, vector<56x128xf32>
    %c0_1 = arith.constant 0 : index
    %c0_2 = arith.constant 0 : index
    %1 = vector.load %arg2[%c0_1, %c0_2] : memref<128x128xf32, #tpu.memory_space<vmem>>, vector<128x128xf32>
    %cst = arith.constant dense<0.000000e+00> : vector<56x128xf32>
    %2 = tpu.matmul %0, %1, %cst {dimension_numbers = #tpu.dot_dimension_numbers<[1], [0], [0], [1], [0, 0, 1, 1], [], []>} : vector<56x128xf32>, vector<128x128xf32>, vector<56x128xf32> -> vector<56x128xf32>
    %c0_3 = arith.constant 0 : index
    %c0_4 = arith.constant 0 : index
    %3 = vector.load %arg3[%c0_3, %c0_4] : memref<1x128xf32, #tpu.memory_space<vmem>>, vector<1x128xf32>
    %4 = vector.broadcast %3 : vector<1x128xf32> to vector<56x128xf32>
    %5 = arith.addf %2, %4 : vector<56x128xf32>
    %cst_5 = arith.constant 0.000000e+00 : f32
    %6 = vector.broadcast %cst_5 : f32 to vector<56x128xf32>
    %7 = arith.minimumf %5, %6 : vector<56x128xf32>
    %8 = math.exp %7 : vector<56x128xf32>
    %c0_6 = arith.constant 0 : index
    %c0_7 = arith.constant 0 : index
    %9 = vector.load %arg4[%c0_6, %c0_7] : memref<56x128xf32, #tpu.memory_space<vmem>>, vector<56x128xf32>
    tpu.vector_store %arg4[%c0_6, %c0_7], %8 {strides = array<i32>} : memref<56x128xf32, #tpu.memory_space<vmem>>, vector<56x128xf32>,
    return
  }
  func.func @transform_0(%arg0: i32) -> (i32, i32) {
    %c0_i32 = arith.constant 0 : i32
    %c0_i32_0 = arith.constant 0 : i32
    return %arg0, %c0_i32 : i32, i32
  }
  func.func @transform_1(%arg0: i32) -> (i32, i32) {
    %c0_i32 = arith.constant 0 : i32
    %c0_i32_0 = arith.constant 0 : i32
    %c0_i32_1 = arith.constant 0 : i32
    return %c0_i32, %c0_i32_0 : i32, i32
  }
  func.func @transform_2(%arg0: i32) -> (i32, i32) {
    %c0_i32 = arith.constant 0 : i32
    %c0_i32_0 = arith.constant 0 : i32
    %c0_i32_1 = arith.constant 0 : i32
    return %c0_i32, %c0_i32_0 : i32, i32
  }
  func.func @transform_3(%arg0: i32) -> (i32, i32) {
    %c0_i32 = arith.constant 0 : i32
    %c0_i32_0 = arith.constant 0 : i32
    return %arg0, %c0_i32 : i32, i32
  }
}

</mosaic_0001>

<bundles_post_ra>
// kernel: tpu_custom_call.1
= control target key start
LH: loop header
LB: loop body
LE: loop exit
PB: predicated region body
PF: predicated region fallthrough
CT: control target
= control target key end

     0   :  { %8 = vsyncpa [#allocation3], 0  ;;  %s509_s0 = inlined_call_operand.hbm [shape: f32[50,128], index: 0, kind: input, shape index: {}]   ;;  %s510_s1 = inlined_call_operand.hbm [shape: f32[128,128], index: 1, kind: input, shape index: {}]   ;;  %s511_s2 = inlined_call_operand.vmem [shape: f32[1,128], index: 2, kind: input, shape index: {}]   ;;  %s512_s3 = inlined_call_operand.hbm [shape: f32[50,128], index: 3, kind: output, shape index: {}]  }
   0x1   :  { %9 = vsyncpa [#allocation6], 0 }
   0x2   :  { %10 = vsyncpa [#allocation4], 0  ;;  %s415_s12 = smov [#allocation2]  }
   0x3   :  { %s16_s13 = sshll.u32 %s415_s12, 4  ;;  %s17_s13 = int_to_ptr.vmem [resolvable:$true] %s16_s13 }
   0x4   :  { %s357_s14 = scalar_lea.vmem %s17_s13, 896  ;;  %p362_p1 = scmp.lt.s32.totalorder %s17_s13, %s17_s13 }
   0x5   :  { %p358_p0 = scmp.ne.s32.totalorder %s17_s13, %s357_s14  ;;  %p363_p2 = scmp.lt.s32.totalorder %s357_s14, %s357_s14 }
   0x7   :  { %p364_p3 = por %p363_p2, %p362_p1 }
   0x9   :  { %p365_p4 = pnand %p364_p3, %p358_p0 }
   0xb   :  { %368 = shalt.err (!%p365_p4)
}
   0xc   :  { %s416_s15 = smov 128   ;;  %s417_s16 = smov 8  }
   0xd   :  { %22 = dma.hbm_to_vmem [thread:$0]  %s509_s0, 896, %s17_s13, [#allocation3], %s416_s15, %s416_s15, %s417_s16  }
   0xe   :  { %s418_s19 = smov [#allocation5]  }
   0xf   :  { %s28_s20 = sshll.u32 %s418_s19, 4  ;;  %s29_s20 = int_to_ptr.vmem [resolvable:$true] %s28_s20 }
  0x10   :  { %s377_s21 = scalar_lea.vmem %s29_s20, 2048  ;;  %p382_p6 = scmp.lt.s32.totalorder %s29_s20, %s29_s20 }
  0x11   :  { %p378_p5 = scmp.ne.s32.totalorder %s29_s20, %s377_s21  ;;  %p383_p7 = scmp.lt.s32.totalorder %s377_s21, %s377_s21 }
  0x13   :  { %p384_p8 = por %p383_p7, %p382_p6 }
  0x15   :  { %p385_p9 = pnand %p384_p8, %p378_p5 }
  0x17   :  { %388 = shalt.err (!%p385_p9)
}
  0x18   :  { %34 = dma.hbm_to_vmem [thread:$0]  %s510_s1, 2048, %s29_s20, [#allocation6], %s416_s15, %s416_s15, %s417_s16  }
  0x19   :  { %409 = dma.done.wait [#allocation3], 896  }
  0x1a   :  { %410 = vsyncadd [#allocation3], 4294966400 }
  0x1b   :  { %411 = dma.done.wait [#allocation6], 2048  }
  0x1c   :  { %412 = vsyncadd [#allocation6], 4294965248  ;;  %v419_v0 = vmov 0.0   ;;  %vm420_vm0 = vmmov 0   ;;  %v65_v1 = vld [vmem:[#allocation5 + $0x78] sm:$0xff]  ;;  %v64_v2 = vld [vmem:[#allocation5 + $0x70] sm:$0xff] }
  0x1d   :  { %243 = vmatprep.subr.mxu0 %v419_v0  ;;  %296 = vmatprep.subr.mxu1 %v419_v0  ;;  %v63_v3 = vld [vmem:[#allocation5 + $0x68] sm:$0xff]  ;;  %v62_v4 = vld [vmem:[#allocation5 + $0x60] sm:$0xff]  ;;  %v61_v5 = vld [vmem:[#allocation5 + $0x58] sm:$0xff] }
  0x1e   :  { %275 = vmatprep.mubr.msk.f32.mxu0 %vm420_vm0, %v419_v0  ;;  %287 = vmatprep.mubr.msk.f32.mxu1 %vm420_vm0, %v419_v0  ;;  %v60_v6 = vld [vmem:[#allocation5 + $0x50] sm:$0xff]  ;;  %v59_v7 = vld [vmem:[#allocation5 + $0x48] sm:$0xff]  ;;  %v58_v8 = vld [vmem:[#allocation5 + $0x40] sm:$0xff] }
  0x1f   :  { %244 = vmatpush3.msra.mxu0 %v65_v1  ;;  %312 = vmatpush3.msra.mxu1 %v65_v1  ;;  %v57_v9 = vld [vmem:[#allocation5 + $0x38] sm:$0xff]  ;;  %v56_v10 = vld [vmem:[#allocation5 + $0x30] sm:$0xff]  ;;  %v55_v11 = vld [vmem:[#allocation5 + $0x28] sm:$0xff] }
  0x20   :  { %245 = vmatprep.subr.mxu0 %v419_v0  ;;  %297 = vmatprep.subr.mxu1 %v419_v0  ;;  %v54_v12 = vld [vmem:[#allocation5 + $0x20] sm:$0xff]  ;;  %v53_v13 = vld [vmem:[#allocation5 + $0x18] sm:$0xff]  ;;  %v52_v14 = vld [vmem:[#allocation5 + $0x10] sm:$0xff] }
  0x21   :  { %246 = vmatpush3.msra.mxu0 %v64_v2  ;;  %313 = vmatpush3.msra.mxu1 %v64_v2  ;;  %v51_v15 = vld [vmem:[#allocation5 + $0x8] sm:$0xff]  ;;  %v50_v16 = vld [vmem:[#allocation5] sm:$0xff]  ;;  %v44_v19 = vld [vmem:[#allocation2 + $0x8] sm:$0xff] }
  0x22   :  { %247 = vmatprep.subr.mxu0 %v419_v0  ;;  %298 = vmatprep.subr.mxu1 %v419_v0  ;;  %v43_v17 = vld [vmem:[#allocation2] sm:$0xff]  ;;  %v48_v20 = vld [vmem:[#allocation2 + $0x28] sm:$0xff]  ;;  %v45_v21 = vld [vmem:[#allocation2 + $0x10] sm:$0xff] }
  0x23   :  { %248 = vmatpush3.msra.mxu0 %v63_v3  ;;  %314 = vmatpush3.msra.mxu1 %v63_v3  ;;  %v47_v18 = vld [vmem:[#allocation2 + $0x20] sm:$0xff]  ;;  %v49_v22 = vld [vmem:[#allocation2 + $0x30] sm:$0xff]  ;;  %v46_v23 = vld [vmem:[#allocation2 + $0x18] sm:$0xff] }
  0x24   :  { %249 = vmatprep.subr.mxu0 %v419_v0  ;;  %299 = vmatprep.subr.mxu1 %v419_v0  ;;  %v219_v24 = vld [vmem:[%s511_s2] ss:$0 sm:$0xff]  ;;  %s421_s2 = smov [#allocation7]  }
  0x25   :  { %250 = vmatpush3.msra.mxu0 %v62_v4  ;;  %315 = vmatpush3.msra.mxu1 %v62_v4  ;;  %s206_s24 = sshll.u32 %s421_s2, 4  ;;  %s207_s24 = int_to_ptr.vmem [resolvable:$true] %s206_s24 }
  0x26   :  { %251 = vmatprep.subr.mxu0 %v419_v0  ;;  %300 = vmatprep.subr.mxu1 %v419_v0  ;;  %s389_s25 = scalar_lea.vmem %s207_s24, 896  ;;  %p394_p11 = scmp.lt.s32.totalorder %s207_s24, %s207_s24 }
  0x27   :  { %252 = vmatpush3.msra.mxu0 %v61_v5  ;;  %316 = vmatpush3.msra.mxu1 %v61_v5  ;;  %p390_p10 = scmp.ne.s32.totalorder %s207_s24, %s389_s25  ;;  %p395_p12 = scmp.lt.s32.totalorder %s389_s25, %s389_s25 }
  0x28   :  { %253 = vmatprep.subr.mxu0 %v419_v0  ;;  %301 = vmatprep.subr.mxu1 %v419_v0 }
  0x29   :  { %254 = vmatpush3.msra.mxu0 %v60_v6  ;;  %317 = vmatpush3.msra.mxu1 %v60_v6  ;;  %p396_p13 = por %p395_p12, %p394_p11 }
  0x2a   :  { %255 = vmatprep.subr.mxu0 %v419_v0  ;;  %302 = vmatprep.subr.mxu1 %v419_v0 }
  0x2b   :  { %256 = vmatpush3.msra.mxu0 %v59_v7  ;;  %318 = vmatpush3.msra.mxu1 %v59_v7  ;;  %p397_p0 = pnand %p396_p13, %p390_p10 }
  0x2c   :  { %257 = vmatprep.subr.mxu0 %v419_v0  ;;  %303 = vmatprep.subr.mxu1 %v419_v0 }
  0x2d   :  { %258 = vmatpush3.msra.mxu0 %v58_v8  ;;  %319 = vmatpush3.msra.mxu1 %v58_v8 }
  0x2e   :  { %259 = vmatprep.subr.mxu0 %v419_v0  ;;  %304 = vmatprep.subr.mxu1 %v419_v0 }
  0x2f   :  { %260 = vmatpush3.msra.mxu0 %v57_v9  ;;  %320 = vmatpush3.msra.mxu1 %v57_v9 }
  0x30   :  { %261 = vmatprep.subr.mxu0 %v419_v0  ;;  %305 = vmatprep.subr.mxu1 %v419_v0 }
  0x31   :  { %262 = vmatpush3.msra.mxu0 %v56_v10  ;;  %321 = vmatpush3.msra.mxu1 %v56_v10 }
  0x32   :  { %263 = vmatprep.subr.mxu0 %v419_v0  ;;  %306 = vmatprep.subr.mxu1 %v419_v0 }
  0x33   :  { %264 = vmatpush3.msra.mxu0 %v55_v11  ;;  %322 = vmatpush3.msra.mxu1 %v55_v11 }
  0x34   :  { %265 = vmatprep.subr.mxu0 %v419_v0  ;;  %307 = vmatprep.subr.mxu1 %v419_v0 }
  0x35   :  { %266 = vmatpush3.msra.mxu0 %v54_v12  ;;  %323 = vmatpush3.msra.mxu1 %v54_v12 }
  0x36   :  { %267 = vmatprep.subr.mxu0 %v419_v0  ;;  %308 = vmatprep.subr.mxu1 %v419_v0 }
  0x37   :  { %268 = vmatpush3.msra.mxu0 %v53_v13  ;;  %324 = vmatpush3.msra.mxu1 %v53_v13 }
  0x38   :  { %269 = vmatprep.subr.mxu0 %v419_v0  ;;  %309 = vmatprep.subr.mxu1 %v419_v0 }
  0x39   :  { %270 = vmatpush3.msra.mxu0 %v52_v14  ;;  %325 = vmatpush3.msra.mxu1 %v52_v14 }
  0x3a   :  { %271 = vmatprep.subr.mxu0 %v419_v0  ;;  %310 = vmatprep.subr.mxu1 %v419_v0 }
  0x3b   :  { %272 = vmatpush3.msra.mxu0 %v51_v15  ;;  %326 = vmatpush3.msra.mxu1 %v51_v15 }
  0x3c   :  { %273 = vmatprep.subr.mxu0 %v419_v0  ;;  %311 = vmatprep.subr.mxu1 %v419_v0 }
  0x3d   :  { %274 = vmatpush3.msra.mxu0 %v50_v16  ;;  %327 = vmatpush3.msra.mxu1 %v50_v16 }
  0x3e   :  { %276 = vmatmul.mubr.f32.vlgmr.msra.gmra.mxu0 %v43_v17  ;;  %288 = vmatmul.mubr.f32.vlgmr.msra.gmra.mxu1 %v47_v18 }
  0x3f   :  { %278 = vmatprep.mubr.msk.f32.mxu0 %vm420_vm0, %v419_v0  ;;  %290 = vmatprep.mubr.msk.f32.mxu1 %vm420_vm0, %v419_v0 }
  0x42   :  { %279 = vmatmul.mubr.f32.gmra.mxu0 %v44_v19  ;;  %291 = vmatmul.mubr.f32.gmra.mxu1 %v48_v20 }
  0x43   :  { %281 = vmatprep.mubr.msk.f32.mxu0 %vm420_vm0, %v419_v0  ;;  %293 = vmatprep.mubr.msk.f32.mxu1 %vm420_vm0, %v419_v0 }
  0x46   :  { %282 = vmatmul.mubr.f32.gmra.mxu0 %v45_v21  ;;  %294 = vmatmul.mubr.f32.gmra.mxu1 %v49_v22 }
  0x47   :  { %284 = vmatprep.mubr.msk.f32.mxu0 %vm420_vm0, %v419_v0 }
  0x4a   :  { %285 = vmatmul.mubr.f32.gmra.mxu0 %v46_v23 }
  0xfe   :  { %v139_v25 = vpop.f32.mrf.mxu0  ;;  %v159_v26 = vpop.f32.mrf.mxu1 }
  0xff   :  { %v140_v27 = vadd.f32 %v219_v24, %v139_v25  ;;  %v160_v28 = vadd.f32 %v219_v24, %v159_v26 }
 0x100   :  { %v277_v29 = vpop.f32.mrf.mxu0  ;;  %v289_v30 = vpop.f32.mrf.mxu1 }
 0x101   :  { %v173_v31 = vmin.f32 %v140_v27, 0.0  ;;  %v177_v32 = vmin.f32 %v160_v28, 0.0 }
 0x102   :  { %v144_v33 = vpop.f32.mrf.mxu0  ;;  %v164_v34 = vpop.f32.mrf.mxu1 }
 0x103   :  { %v180_v35 = vmul.f32 1.442695, %v173_v31  ;;  %v188_v36 = vmul.f32 1.442695, %v177_v32  ;;  %v145_v37 = vadd.f32 %v219_v24, %v144_v33  ;;  %v165_v38 = vadd.f32 %v219_v24, %v164_v34 }
 0x104   :  { %v280_v39 = vpop.f32.mrf.mxu0  ;;  %v292_v40 = vpop.f32.mrf.mxu1 }
 0x105   :  { %335 = vpow2.f32 %v180_v35  ;;  %v174_v41 = vmin.f32 %v145_v37, 0.0  ;;  %v178_v42 = vmin.f32 %v165_v38, 0.0 }
 0x106   :  { %337 = vpow2.f32 %v188_v36  ;;  %v149_v43 = vpop.f32.mrf.mxu0  ;;  %v169_v44 = vpop.f32.mrf.mxu1 }
 0x107   :  { %v182_v45 = vmul.f32 1.442695, %v174_v41  ;;  %v190_v46 = vmul.f32 1.442695, %v178_v42  ;;  %v150_v47 = vadd.f32 %v219_v24, %v149_v43  ;;  %v170_v48 = vadd.f32 %v219_v24, %v169_v44 }
 0x108   :  { %v283_v49 = vpop.f32.mrf.mxu0  ;;  %v295_v50 = vpop.f32.mrf.mxu1 }
 0x109   :  { %339 = vpow2.f32 %v182_v45  ;;  %v175_v51 = vmin.f32 %v150_v47, 0.0  ;;  %v179_v52 = vmin.f32 %v170_v48, 0.0 }
 0x10a   :  { %341 = vpow2.f32 %v190_v46  ;;  %v154_v53 = vpop.f32.mrf.mxu0 }
 0x10b   :  { %v184_v54 = vmul.f32 1.442695, %v175_v51  ;;  %v192_v55 = vmul.f32 1.442695, %v179_v52  ;;  %v155_v56 = vadd.f32 %v219_v24, %v154_v53 }
 0x10c   :  { %v286_v57 = vpop.f32.mrf.mxu0 }
 0x10d   :  { %343 = vpow2.f32 %v184_v54  ;;  %v176_v58 = vmin.f32 %v155_v56, 0.0 }
 0x10e   :  { %345 = vpow2.f32 %v192_v55 }
 0x10f   :  { %v186_v59 = vmul.f32 1.442695, %v176_v58 }
 0x111   :  { %347 = vpow2.f32 %v186_v59 }
 0x112   :  { %v336_v60 = vpop.eup %335 }
 0x113   :  { %v338_v61 = vpop.eup %337  ;;  %194 = vst [vmem:[#allocation7] sm:$0xff] %v336_v60 }
 0x114   :  { %198 = vst [vmem:[#allocation7 + $0x20] sm:$0xff] %v338_v61 }
 0x116   :  { %v340_v62 = vpop.eup %339 }
 0x117   :  { %v342_v63 = vpop.eup %341  ;;  %195 = vst [vmem:[#allocation7 + $0x8] sm:$0xff] %v340_v62 }
 0x118   :  { %199 = vst [vmem:[#allocation7 + $0x28] sm:$0xff] %v342_v63 }
 0x11a   :  { %v344_v0 = vpop.eup %343 }
 0x11b   :  { %v346_v1 = vpop.eup %345  ;;  %196 = vst [vmem:[#allocation7 + $0x10] sm:$0xff] %v344_v0 }
 0x11c   :  { %200 = vst [vmem:[#allocation7 + $0x30] sm:$0xff] %v346_v1 }
 0x11e   :  { %v348_v2 = vpop.eup %347 }
 0x11f   :  { %197 = vst [vmem:[#allocation7 + $0x18] sm:$0xff] %v348_v2 }
 0x120   :  { %400 = shalt.err (!%p397_p0)
}
 0x121   :  { %212 = dma.vmem_to_hbm [thread:$0]  %s207_s24, 896, %s512_s3, [#allocation4], %s416_s15, %s416_s15, %s417_s16  }
 0x122   :  { %413 = dma.done.wait [#allocation4], 896  }
 0x123   :  { %414 = vsyncadd [#allocation4], 4294966400 }
 0x124   :  { %216 = vsyncpa [#allocation3], 1 }
 0x125   :  { %217 = vsyncpa [#allocation6], 1 }
 0x126   :  { %218 = vsyncpa [#allocation4], 1 }

</bundles_post_ra>
